<compile_context>
chip_gen: v5e
topology: v5e:2x2
jax: 0.10.0
libtpu: 0.0.40
codegen_flags: <defaults>
</compile_context>

<pallas_src>
import functools

import jax
import jax.numpy as jnp
from jax.experimental import pallas as pl
from jax.experimental.pallas import tpu as pltpu


def _dw_conv_kernel(w_ref, x_ref, o_ref, xp_ref, *, k, stride, pad, H, W, Ho, Wo):
    """Depthwise 2-D convolution on one (Cb, H, W) channel block.

    w_ref  : VMEM (Cb, k, k) float32 filter taps for this channel block.
    x_ref  : VMEM (Cb, H, W) input block, native dtype.
    o_ref  : VMEM (Cb, Ho, Wo) output block.
    xp_ref : VMEM (Cb, H+2p, W+2p) float32 scratch -- zero-padded input built
             here in VMEM instead of as a separate HBM round trip.
    """
    # Fused zero-padding: halo'd copy of the block, rebuilt each grid step.
    xp_ref[...] = jnp.zeros_like(xp_ref)
    xp_ref[:, pad:pad + H, pad:pad + W] = x_ref[...].astype(jnp.float32)

    w = w_ref[...]                                    # (Cb, k, k), loaded once

    acc = None
    for dy in range(k):                               # k*k fully unrolled taps
        for dx in range(k):
            if stride == 1:
                patch = xp_ref[:, dy:dy + Ho, dx:dx + Wo]
            else:                                     # strided window reads
                patch = xp_ref[:, pl.ds(dy, Ho, stride), pl.ds(dx, Wo, stride)]
            term = w[:, dy:dy + 1, dx:dx + 1] * patch  # vector FMA over block
            acc = term if acc is None else acc + term
    o_ref[...] = acc.astype(o_ref.dtype)


def _vmem_budget_and_limit():
    """(per-block VMEM budget, scoped vmem limit) sized per TPU generation."""
    try:
        cap = int(pltpu.get_tpu_info().vmem_capacity_bytes)
    except Exception:                       # conservative fallback (v7x-safe)
        cap = 64 * 1024 * 1024
    if cap >= 100 * 1024 * 1024:            # v5e / v6e: 128 MiB physical VMEM
        return 36 * 1024 * 1024, 80 * 1024 * 1024
    return 20 * 1024 * 1024, 48 * 1024 * 1024   # v7x: 64 MiB per TensorCore


def channelwise_conv(x, w, *, stride=1):
    """x: (N, C, H, W); w: (C, k, k) depthwise filters (groups=C, no bias)."""
    N, C, H, W = x.shape
    Cw, kh, kw_ = w.shape
    assert kh == kw_, "square kernels only"
    # TODO(synk): channel-multiplier case (nOut = m * nIn, m > 1) not implemented.
    assert Cw == C, "depthwise path assumes nOut == nIn"

    k = kh
    pad = (k - 1) // 2
    Ho = (H + 2 * pad - k) // stride + 1
    Wo = (W + 2 * pad - k) // stride + 1
    Hp = H + 2 * pad
    Wp = W + 2 * pad

    x_b = x.dtype.itemsize
    w_f32 = w.astype(jnp.float32)

    budget_bytes, vmem_limit = _vmem_budget_and_limit()

    # Per-channel VMEM footprint: double-buffered in/out blocks + f32 halo
    # scratch + the f32 accumulator the compiler keeps live in vregs/VMEM.
    per_chan = (2 * H * W * x_b + 2 * Ho * Wo * x_b
                + Hp * Wp * 4 + Ho * Wo * 4 + 2 * k * k * 4)
    Cb = int(max(1, min(C, budget_bytes // per_chan, 512)))
    # Keep >= 2 parallel grid steps so both v7x TensorCores get work.
    if N * pl.cdiv(C, Cb) < 2 and C > 1:
        Cb = pl.cdiv(C, 2)
    n_cblk = pl.cdiv(C, Cb)
    # TODO(synk): very large H*W (single-channel block > budget) would need an
    # extra halo'd H-tile grid axis; CGNet feature-map sizes do not hit this.

    kernel = functools.partial(_dw_conv_kernel, k=k, stride=stride, pad=pad,
                               H=H, W=W, Ho=Ho, Wo=Wo)

    cost = pl.CostEstimate(
        flops=2 * N * C * Ho * Wo * k * k,
        transcendentals=0,
        bytes_accessed=(N * C * H * W * x_b + C * k * k * 4
                        + N * C * Ho * Wo * x_b),
    )

    return pl.pallas_call(
        kernel,
        out_shape=jax.ShapeDtypeStruct((N, C, Ho, Wo), x.dtype),
        grid=(N, n_cblk),
        in_specs=[
            # Per-block filter tile (tiny), resident in VMEM.
            pl.BlockSpec((Cb, k, k), lambda n, c: (c, 0, 0)),
            # Input block: native dtype, full spatial extent, batch squeezed.
            pl.BlockSpec((None, Cb, H, W), lambda n, c: (n, c, 0, 0)),
        ],
        out_specs=pl.BlockSpec((None, Cb, Ho, Wo), lambda n, c: (n, c, 0, 0)),
        scratch_shapes=[pltpu.VMEM((Cb, Hp, Wp), jnp.float32)],
        compiler_params=pltpu.CompilerParams(
            dimension_semantics=("parallel", "parallel"),
            vmem_limit_bytes=vmem_limit,
        ),
        cost_estimate=cost,
    )(w_f32, x)


if __name__ == "__main__":
    key = jax.random.PRNGKey(0)
    kx, kw = jax.random.split(key)

    N, C, H, W = 2, 4, 16, 16
    kSize, stride = 3, 1

    x = jax.random.normal(kx, (N, C, H, W), dtype=jnp.float32)
    # Depthwise filter: one kSize x kSize tap set per channel (groups=nIn, no bias).
    w = 0.1 * jax.random.normal(kw, (C, kSize, kSize), dtype=jnp.float32)

    out = channelwise_conv(x, w, stride=stride)
    jax.block_until_ready(out)

    # Pure-JAX reference: grouped (depthwise) convolution, same padding/stride.
    pad = (kSize - 1) // 2
    ref = jax.lax.conv_general_dilated(
        x, w.reshape(C, 1, kSize, kSize),
        window_strides=(stride, stride),
        padding=((pad, pad), (pad, pad)),
        dimension_numbers=("NCHW", "OIHW", "NCHW"),
        feature_group_count=C)

    assert out.shape == ref.shape, (out.shape, ref.shape)
    err = jnp.max(jnp.abs(out - ref))
    assert err < 1e-4, f"mismatch vs reference: {err}"
    print("KERNEL_OK")
</pallas_src>

<mosaic_0001>
module attributes {stable_mosaic.version = 11 : i64} {
  func.func @_dw_conv_kernel(%arg0: i32, %arg1: i32, %arg2: memref<4x3x3xf32, #tpu.memory_space<vmem>>, %arg3: memref<1x4x16x16xf32, #tpu.memory_space<vmem>>, %arg4: memref<1x4x16x16xf32, #tpu.memory_space<vmem>>, %arg5: memref<4x18x18xf32, #tpu.memory_space<vmem>>) attributes {dimension_semantics = [#tpu.dimension_semantics<parallel>, #tpu.dimension_semantics<parallel>], iteration_bounds = array<i64: 2, 1>, scalar_prefetch = 0 : i64, scratch_operands = 1 : i64, tpu.core_type = #tpu.core_type<tc>, window_params = [{transform_indices = @transform_0, window_bounds = array<i64: 4, 3, 3>}, {transform_indices = @transform_1, window_bounds = array<i64: 1, 4, 16, 16>}, {transform_indices = @transform_2, window_bounds = array<i64: 1, 4, 16, 16>}]} {
    %cst = arith.constant 0.000000e+00 : f32
    %0 = vector.broadcast %cst : f32 to vector<4x18x18xf32>
    %c0 = arith.constant 0 : index
    %c0_0 = arith.constant 0 : index
    %c0_1 = arith.constant 0 : index
    %1 = vector.load %arg5[%c0, %c0_0, %c0_1] : memref<4x18x18xf32, #tpu.memory_space<vmem>>, vector<4x18x18xf32>
    tpu.vector_store %arg5[%c0, %c0_0, %c0_1], %0 {strides = array<i32>} : memref<4x18x18xf32, #tpu.memory_space<vmem>>, vector<4x18x18xf32>,
    %c0_2 = arith.constant 0 : index
    %c0_3 = arith.constant 0 : index
    %c0_4 = arith.constant 0 : index
    %c0_5 = arith.constant 0 : index
    %2 = vector.load %arg3[%c0_2, %c0_3, %c0_4, %c0_5] : memref<1x4x16x16xf32, #tpu.memory_space<vmem>>, vector<1x4x16x16xf32>
    %3 = vector.shape_cast %2 : vector<1x4x16x16xf32> to vector<4x16x16xf32>
    %c0_6 = arith.constant 0 : index
    %c1 = arith.constant 1 : index
    %c1_7 = arith.constant 1 : index
    %4 = vector.load %arg5[%c0_6, %c1, %c1_7] : memref<4x18x18xf32, #tpu.memory_space<vmem>>, vector<4x16x16xf32>
    tpu.vector_store %arg5[%c0_6, %c1, %c1_7], %3 {strides = array<i32>} : memref<4x18x18xf32, #tpu.memory_space<vmem>>, vector<4x16x16xf32>,
    %c0_8 = arith.constant 0 : index
    %c0_9 = arith.constant 0 : index
    %c0_10 = arith.constant 0 : index
    %5 = vector.load %arg2[%c0_8, %c0_9, %c0_10] : memref<4x3x3xf32, #tpu.memory_space<vmem>>, vector<4x3x3xf32>
    %c0_11 = arith.constant 0 : index
    %c0_12 = arith.constant 0 : index
    %c0_13 = arith.constant 0 : index
    %6 = vector.load %arg5[%c0_11, %c0_12, %c0_13] : memref<4x18x18xf32, #tpu.memory_space<vmem>>, vector<4x16x16xf32>
    %7 = vector.extract_strided_slice %5 {offsets = [0, 0, 0], sizes = [4, 1, 1], strides = [1, 1, 1]} : vector<4x3x3xf32> to vector<4x1x1xf32>
    %8 = vector.broadcast %7 : vector<4x1x1xf32> to vector<4x16x16xf32>
    %9 = arith.mulf %8, %6 : vector<4x16x16xf32>
    %c0_14 = arith.constant 0 : index
    %c0_15 = arith.constant 0 : index
    %c1_16 = arith.constant 1 : index
    %10 = vector.load %arg5[%c0_14, %c0_15, %c1_16] : memref<4x18x18xf32, #tpu.memory_space<vmem>>, vector<4x16x16xf32>
    %11 = vector.extract_strided_slice %5 {offsets = [0, 0, 1], sizes = [4, 1, 1], strides = [1, 1, 1]} : vector<4x3x3xf32> to vector<4x1x1xf32>
    %12 = vector.broadcast %11 : vector<4x1x1xf32> to vector<4x16x16xf32>
    %13 = arith.mulf %12, %10 : vector<4x16x16xf32>
    %14 = arith.addf %9, %13 : vector<4x16x16xf32>
    %c0_17 = arith.constant 0 : index
    %c0_18 = arith.constant 0 : index
    %c2 = arith.constant 2 : index
    %15 = vector.load %arg5[%c0_17, %c0_18, %c2] : memref<4x18x18xf32, #tpu.memory_space<vmem>>, vector<4x16x16xf32>
    %16 = vector.extract_strided_slice %5 {offsets = [0, 0, 2], sizes = [4, 1, 1], strides = [1, 1, 1]} : vector<4x3x3xf32> to vector<4x1x1xf32>
    %17 = vector.broadcast %16 : vector<4x1x1xf32> to vector<4x16x16xf32>
    %18 = arith.mulf %17, %15 : vector<4x16x16xf32>
    %19 = arith.addf %14, %18 : vector<4x16x16xf32>
    %c0_19 = arith.constant 0 : index
    %c1_20 = arith.constant 1 : index
    %c0_21 = arith.constant 0 : index
    %20 = vector.load %arg5[%c0_19, %c1_20, %c0_21] : memref<4x18x18xf32, #tpu.memory_space<vmem>>, vector<4x16x16xf32>
    %21 = vector.extract_strided_slice %5 {offsets = [0, 1, 0], sizes = [4, 1, 1], strides = [1, 1, 1]} : vector<4x3x3xf32> to vector<4x1x1xf32>
    %22 = vector.broadcast %21 : vector<4x1x1xf32> to vector<4x16x16xf32>
    %23 = arith.mulf %22, %20 : vector<4x16x16xf32>
    %24 = arith.addf %19, %23 : vector<4x16x16xf32>
    %c0_22 = arith.constant 0 : index
    %c1_23 = arith.constant 1 : index
    %c1_24 = arith.constant 1 : index
    %25 = vector.load %arg5[%c0_22, %c1_23, %c1_24] : memref<4x18x18xf32, #tpu.memory_space<vmem>>, vector<4x16x16xf32>
    %26 = vector.extract_strided_slice %5 {offsets = [0, 1, 1], sizes = [4, 1, 1], strides = [1, 1, 1]} : vector<4x3x3xf32> to vector<4x1x1xf32>
    %27 = vector.broadcast %26 : vector<4x1x1xf32> to vector<4x16x16xf32>
    %28 = arith.mulf %27, %25 : vector<4x16x16xf32>
    %29 = arith.addf %24, %28 : vector<4x16x16xf32>
    %c0_25 = arith.constant 0 : index
    %c1_26 = arith.constant 1 : index
    %c2_27 = arith.constant 2 : index
    %30 = vector.load %arg5[%c0_25, %c1_26, %c2_27] : memref<4x18x18xf32, #tpu.memory_space<vmem>>, vector<4x16x16xf32>
    %31 = vector.extract_strided_slice %5 {offsets = [0, 1, 2], sizes = [4, 1, 1], strides = [1, 1, 1]} : vector<4x3x3xf32> to vector<4x1x1xf32>
    %32 = vector.broadcast %31 : vector<4x1x1xf32> to vector<4x16x16xf32>
    %33 = arith.mulf %32, %30 : vector<4x16x16xf32>
    %34 = arith.addf %29, %33 : vector<4x16x16xf32>
    %c0_28 = arith.constant 0 : index
    %c2_29 = arith.constant 2 : index
    %c0_30 = arith.constant 0 : index
    %35 = vector.load %arg5[%c0_28, %c2_29, %c0_30] : memref<4x18x18xf32, #tpu.memory_space<vmem>>, vector<4x16x16xf32>
    %36 = vector.extract_strided_slice %5 {offsets = [0, 2, 0], sizes = [4, 1, 1], strides = [1, 1, 1]} : vector<4x3x3xf32> to vector<4x1x1xf32>
    %37 = vector.broadcast %36 : vector<4x1x1xf32> to vector<4x16x16xf32>
    %38 = arith.mulf %37, %35 : vector<4x16x16xf32>
    %39 = arith.addf %34, %38 : vector<4x16x16xf32>
    %c0_31 = arith.constant 0 : index
    %c2_32 = arith.constant 2 : index
    %c1_33 = arith.constant 1 : index
    %40 = vector.load %arg5[%c0_31, %c2_32, %c1_33] : memref<4x18x18xf32, #tpu.memory_space<vmem>>, vector<4x16x16xf32>
    %41 = vector.extract_strided_slice %5 {offsets = [0, 2, 1], sizes = [4, 1, 1], strides = [1, 1, 1]} : vector<4x3x3xf32> to vector<4x1x1xf32>
    %42 = vector.broadcast %41 : vector<4x1x1xf32> to vector<4x16x16xf32>
    %43 = arith.mulf %42, %40 : vector<4x16x16xf32>
    %44 = arith.addf %39, %43 : vector<4x16x16xf32>
    %c0_34 = arith.constant 0 : index
    %c2_35 = arith.constant 2 : index
    %c2_36 = arith.constant 2 : index
    %45 = vector.load %arg5[%c0_34, %c2_35, %c2_36] : memref<4x18x18xf32, #tpu.memory_space<vmem>>, vector<4x16x16xf32>
    %46 = vector.extract_strided_slice %5 {offsets = [0, 2, 2], sizes = [4, 1, 1], strides = [1, 1, 1]} : vector<4x3x3xf32> to vector<4x1x1xf32>
    %47 = vector.broadcast %46 : vector<4x1x1xf32> to vector<4x16x16xf32>
    %48 = arith.mulf %47, %45 : vector<4x16x16xf32>
    %49 = arith.addf %44, %48 : vector<4x16x16xf32>
    %c0_37 = arith.constant 0 : index
    %c0_38 = arith.constant 0 : index
    %c0_39 = arith.constant 0 : index
    %c0_40 = arith.constant 0 : index
    %50 = vector.load %arg4[%c0_37, %c0_38, %c0_39, %c0_40] : memref<1x4x16x16xf32, #tpu.memory_space<vmem>>, vector<1x4x16x16xf32>
    %51 = vector.shape_cast %50 : vector<1x4x16x16xf32> to vector<4x16x16xf32>
    %52 = vector.shape_cast %49 : vector<4x16x16xf32> to vector<1x4x16x16xf32>
    tpu.vector_store %arg4[%c0_37, %c0_38, %c0_39, %c0_40], %52 {strides = array<i32>} : memref<1x4x16x16xf32, #tpu.memory_space<vmem>>, vector<1x4x16x16xf32>,
    return
  }
  func.func @transform_0(%arg0: i32, %arg1: i32) -> (i32, i32, i32) {
    %c0_i32 = arith.constant 0 : i32
    %c0_i32_0 = arith.constant 0 : i32
    %c0_i32_1 = arith.constant 0 : i32
    return %arg1, %c0_i32, %c0_i32_0 : i32, i32, i32
  }
  func.func @transform_1(%arg0: i32, %arg1: i32) -> (i32, i32, i32, i32) {
    %c0_i32 = arith.constant 0 : i32
    %c0_i32_0 = arith.constant 0 : i32
    %c0_i32_1 = arith.constant 0 : i32
    return %arg0, %arg1, %c0_i32, %c0_i32_0 : i32, i32, i32, i32
  }
  func.func @transform_2(%arg0: i32, %arg1: i32) -> (i32, i32, i32, i32) {
    %c0_i32 = arith.constant 0 : i32
    %c0_i32_0 = arith.constant 0 : i32
    %c0_i32_1 = arith.constant 0 : i32
    return %arg0, %arg1, %c0_i32, %c0_i32_0 : i32, i32, i32, i32
  }
}

</mosaic_0001>

<bundles_post_ra>
// kernel: tpu_custom_call.1
= control target key start
LH: loop header
LB: loop body
LE: loop exit
PB: predicated region body
PF: predicated region fallthrough
CT: control target
= control target key end

     0   :  { %7 = vsyncpa [#allocation4], 0  ;;  %s1734_s0 = inlined_call_operand.vmem [shape: f32[4,3,3], index: 0, kind: input, shape index: {}]   ;;  %s1735_s1 = inlined_call_operand.hbm [shape: f32[2,4,16,16], index: 1, kind: input, shape index: {}]   ;;  %s1736_s2 = inlined_call_operand.hbm [shape: f32[2,4,16,16], index: 2, kind: output, shape index: {}]  }
   0x1   :  { %9 = vsyncpa [#allocation4 + $0x1], 0 }
   0x2   :  { %10 = vsyncpa [#allocation5], 0 }
   0x3   :  { %12 = vsyncpa [#allocation5 + $0x1], 0  ;;  %s1221_s9 = smov 0   ;;  %s1223_s10 = smov 0  }
   0x4   :  { %s1225_s11 = smov 0   ;;  %s1227_s12 = smov 0  }
   0x5   :  { %s1229_s13 = smov 0   ;;  %s1231_s14 = smov 0  }
   0x6 LB: > { %s924_s15 = sadd.s32 4294967295, %s1196_s14   ;;  %s925_s16 = sadd.s32 4294967294, %s1196_s14   ;;  %s1196_s14 = sphi %s1231_s14, %s18_s14   ;;  %s1192_s13 = sphi %s1229_s13, %s1745_s13   ;;  %s1188_s12 = sphi %s1227_s12, %s1744_s12   ;;  %s1184_s11 = sphi %s1225_s11, %s1743_s11   ;;  %s1180_s10 = sphi %s1223_s10, %s1742_s10   ;;  %s1176_s9 = sphi %s1221_s9, %s1741_s9  }
   0x7   : > { %s30_s17 = sadd.s32 1, %s1192_s13  ;;  %s65_s18 = sadd.s32 1, %s1184_s11 }
   0x8   : > { %p32_p0 = scmp.ge.s32.totalorder %s30_s17, 2  ;;  %p72_p1 = scmp.ne.s32.totalorder %s1184_s11, %s1180_s10 }
   0x9   : > { %p73_p2 = scmp.eq.s32.totalorder %s1196_s14, 0  ;;  %p78_p3 = scmp.ne.s32.totalorder %s1180_s10, %s1176_s9 }
   0xa   : > { %s1747_s17 = smov (%p32_p0, %s30_s17), 0  ;;  %p79_p5 = scmp.eq.s32.totalorder %s924_s15, 0 }
   0xb   : > { %p1262_p4 = por %p73_p2, %p72_p1  ;;  %s60_s20 = ssub.s32 %s1192_s13, %s1747_s17 }
   0xc   : > { %p104_p6 = scmp.eq.s32.totalorder %s924_s15, 1  ;;  %p63_p7 = scmp.eq.s32.totalorder %s60_s20, 0 }
   0xd   : > { %p1268_p8 = por %p79_p5, %p78_p3  ;;  %p110_p10 = scmp.eq.s32.totalorder %s925_s16, 1 }
   0xe   : > { %p1272_p9 = por %p104_p6, %p72_p1  ;;  %p928_p12 = scmp.ge.s32.totalorder %s1196_s14, 2 }
   0xf   : > { %s1277_s23 = scalar_select %p63_p7, %s1184_s11, %s65_s18  }
  0x10   : > { %p1279_p11 = por %p110_p10, %p78_p3  ;;  %p1026_p13 = scmp.lt.s32.totalorder %s1196_s14, 2 }
  0x11   : > { %s139_s25 = sand.u32 1, %s1184_s11   ;;  %s940_s27 = sshll.u32 %s1192_s13, 6 }
  0x12   : > { %s929_s26 = sshll.u32 %s139_s25, 6  ;;  %s151_s30 = scalar_lea.hbm %s1735_s1, %s940_s27 }
  0x13   : > { %s143_s3 = scalar_lea.vmem [#allocation3], %s929_s26  ;;  %s152_s5 = sshll.u32 %s151_s30, 4  ;;  %s153_s5 = int_to_ptr.hbm [resolvable:$true] %s152_s5 }
  0x14   : > { %s154_s4 = sshll.u32 %s143_s3, 4  ;;  %p1019_p0 = pnand %p1026_p13, %p1262_p4  ;;  %s155_s4 = int_to_ptr.vmem [resolvable:$true] %s154_s4 }
  0x15   : > { %p932_p1 = scmp.ge.s32.totalorder %s1196_s14, 1  ;;  %s140_s6 = scalar_lea.sflag [#allocation4], %s139_s25 }
  0x16   : > { %s1198_s7 = smov 128   ;;  %s1199_s8 = smov 8  }
  0x17   : > { %1021 = dma.hbm_to_vmem [thread:$0]  (!%p1019_p0), %s153_s5, 1024, %s155_s4, %s140_s6, %s1198_s7, %s1198_s7, %s1199_s8  }
  0x18   : > { %p162_p2 = scmp.lt.s32.totalorder %s1196_s14, 3 }
  0x1a   : > { %p163_p3 = pnand %p932_p1, %p162_p2 }
  0x1b   : > { %s1295_s15 = sand.u32 (!%p163_p3), 1, %s1180_s10  }
  0x1c   : > { %166 = sbr.rel (%p163_p3) target bundleno = 470 (0x1d6), region = 28  ;;  %s933_s16 = sshll.u32 (!%p163_p3), %s1295_s15, 6 }
  0x1d   : > { %s169_s18 = scalar_lea.sflag (!%p163_p3), [#allocation4], %s1295_s15  ;;  %s172_s19 = scalar_lea.vmem (!%p163_p3), [#allocation3], %s933_s16 }
  0x21   : > { %1167 = dma.done.wait (%p1268_p8), %s169_s18, 1024  }
  0x22   : > { %1169 = vsyncadd (%p1268_p8), %s169_s18, 4294966272  ;;  %v225_v0 = vld [vmem:[%s172_s19 + $0x20] sm:$0xff]  ;;  %v223_v1 = vld [vmem:[%s172_s19 + $0x10] sm:$0xff]  ;;  %s1200_s20 = smov 1   ;;  %s1201_s4 = smov 127   ;;  %vm207_vm0 = vcmask 146432  }
  0x23   : > { %v221_v2 = vld [vmem:[%s172_s19] sm:$0xff]  ;;  %245 = vrot.lane.b32.xlu2 %v225_v0, %s1200_s20  ;;  %241 = vrot.lane.b32.xlu1 %v223_v1, %s1200_s20  ;;  %v272_v5 = vld [vmem:[%s1734_s0 + $0x8] sm:$0x7]  ;;  %s1202_s5 = smov 126   ;;  %v1203_v15 = vmov 0.0   ;;  %vm210_vm1 = vcmask 140288  }
  0x24   : > { %237 = vrot.lane.b32.xlu0 %v221_v2, %s1200_s20  ;;  %v270_v3 = vld [vmem:[%s1734_s0] sm:$0x7]  ;;  %v271_v4 = vld [vmem:[%s1734_s0 + $0x4] sm:$0x7]  ;;  %v273_v6 = vld [vmem:[%s1734_s0 + $0xc] sm:$0x7] }
  0x25   : > { %942 = vpush %v270_v3  ;;  %v226_v7 = vld [vmem:[%s172_s19 + $0x28] sm:$0xff]  ;;  %v224_v8 = vld [vmem:[%s172_s19 + $0x18] sm:$0xff]  ;;  %v227_v11 = vld [vmem:[%s172_s19 + $0x30] sm:$0xff]  ;;  %v1324_v12 = vrot.slane %v272_v5, 1  ;;  %v1326_v13 = vrot.slane %v271_v4, 1  ;;  %v1333_v14 = vrot.slane %v270_v3, 1 }
  0x26   : > { %944 = vpush %v271_v4  ;;  %v222_v9 = vld [vmem:[%s172_s19 + $0x8] sm:$0xff]  ;;  %v228_v10 = vld [vmem:[%s172_s19 + $0x38] sm:$0xff]  ;;  %v1341_v16 = vrot.slane %v270_v3, 2  ;;  %v1343_v17 = vrot.slane %v273_v6, 1  ;;  %v1351_v18 = vrot.slane %v273_v6, 2  ;;  %v1353_v19 = vrot.slane %v272_v5, 2 }
  0x27   : > { %946 = vpush %v272_v5  ;;  %v1361_v20 = vrot.slane %v271_v4, 2  ;;  %vm261_vm2 = vcmask 138248   ;;  %vm794_vm3 = vcmask 130048  }
  0x28   : > { %948 = vpush %v273_v6 }
  0x29   : > { %215 = vst.msk [vmem:[#allocation2 + $0x30] sm:$0xff] %vm207_vm0, %v1203_v15 }
  0x2a   : > { %216 = vst.msk [vmem:[#allocation2 + $0x38] sm:$0xff] %vm207_vm0, %v1203_v15 }
  0x2b   : > { %247 = vrot.lane.b32.xlu2 %v226_v7, %s1200_s20  ;;  %243 = vrot.lane.b32.xlu1 %v224_v8, %s1200_s20  ;;  %208 = vst.msk [vmem:[#allocation2] sm:$0xff] %vm207_vm0, %v1203_v15 }
  0x2c   : > { %239 = vrot.lane.b32.xlu0 %v222_v9, %s1200_s20  ;;  %209 = vst.msk [vmem:[#allocation2 + $0x8] sm:$0xff] %vm207_vm0, %v1203_v15 }
  0x2d   : > { %212 = vst.msk [vmem:[#allocation2 + $0x18] sm:$0xff] %vm207_vm0, %v1203_v15 }
  0x2e   : > { %213 = vst.msk [vmem:[#allocation2 + $0x20] sm:$0xff] %vm207_vm0, %v1203_v15 }
  0x2f   : > { %218 = vst.msk [vmem:[#allocation2 + $0x48] sm:$0xff] %vm207_vm0, %v1203_v15 }
  0x30   : > { %219 = vst.msk [vmem:[#allocation2 + $0x50] sm:$0xff] %vm207_vm0, %v1203_v15 }
  0x31   : > { %217 = vst.msk [vmem:[#allocation2 + $0x40] sm:$0x3] %vm210_vm1, %v1203_v15 }
  0x32   : > { %211 = vst.msk [vmem:[#allocation2 + $0x10] sm:$0x3] %vm210_vm1, %v1203_v15 }
  0x33   : > { %306 = vrot.lane.b32.xlu2 %v270_v3, %s1201_s4  ;;  %251 = vrot.lane.b32.xlu1 %v228_v10, %s1200_s20  ;;  %214 = vst.msk [vmem:[#allocation2 + $0x28] sm:$0x3] %vm210_vm1, %v1203_v15 }
  0x34   : > { %249 = vrot.lane.b32.xlu0 %v227_v11, %s1200_s20  ;;  %220 = vst.msk [vmem:[#allocation2 + $0x58] sm:$0x3] %vm210_vm1, %v1203_v15 }
  0x3b   : > { %310 = vrot.lane.b32.xlu1 %v272_v5, %s1201_s4  ;;  %312 = vrot.lane.b32.xlu2 %v273_v6, %s1201_s4 }
  0x3c   : > { %308 = vrot.lane.b32.xlu0 %v271_v4, %s1201_s4 }
  0x43   : > { %378 = vrot.lane.b32.xlu1 %v272_v5, %s1202_s5  ;;  %374 = vrot.lane.b32.xlu2 %v270_v3, %s1202_s5 }
  0x44   : > { %376 = vrot.lane.b32.xlu0 %v271_v4, %s1202_s5 }
  0x4b   : > { %486 = vrot.lane.b32.xlu1 %v1324_v12, %s1201_s4  ;;  %380 = vrot.lane.b32.xlu2 %v273_v6, %s1202_s5 }
  0x4c   : > { %484 = vrot.lane.b32.xlu0 %v1326_v13, %s1201_s4 }
  0x53   : > { %552 = vrot.lane.b32.xlu1 %v1326_v13, %s1202_s5  ;;  %482 = vrot.lane.b32.xlu2 %v1333_v14, %s1201_s4 }
  0x54   : > { %550 = vrot.lane.b32.xlu0 %v1333_v14, %s1202_s5 }
  0x56   : > { %s1379_s6 = spop %942 }
  0x57   : > { %v284_v32 = vstv %s1379_s6  ;;  %s1382_s7 = spop %944 }
  0x58   : > { %s1393_s8 = spop %946 }
  0x59   : > { %s949_s18 = spop %948 }
  0x5a   : > { %v296_v36 = vstv %s949_s18 }
  0x5b   : > { %658 = vrot.lane.b32.xlu1 %v1341_v16, %s1201_s4  ;;  %488 = vrot.lane.b32.xlu2 %v1343_v17, %s1201_s4 }
  0x5c   : > { %556 = vrot.lane.b32.xlu0 %v1343_v17, %s1202_s5 }
  0x63   : > { %664 = vrot.lane.b32.xlu1 %v1351_v18, %s1201_s4  ;;  %554 = vrot.lane.b32.xlu2 %v1324_v12, %s1202_s5 }
  0x64   : > { %662 = vrot.lane.b32.xlu0 %v1353_v19, %s1201_s4 }
  0x6b   : > { %730 = vrot.lane.b32.xlu1 %v1353_v19, %s1202_s5  ;;  %660 = vrot.lane.b32.xlu2 %v1361_v20, %s1201_s4 }
  0x6c   : > { %728 = vrot.lane.b32.xlu0 %v1361_v20, %s1202_s5 }
  0x73   : > { %726 = vrot.lane.b32.xlu2 %v1341_v16, %s1202_s5 }
  0x7b   : > { %732 = vrot.lane.b32.xlu2 %v1351_v18, %s1202_s5 }
  0x7d   : > { %v246_v21 = vpop.permute.xlu2 %245 }
  0x7e   : > { %266 = vst.msk [vmem:[#allocation2 + $0x31] sm:$0xff] %vm261_vm2, %v246_v21 }
  0x85   : > { %v248_v22 = vpop.permute.xlu2 %247  ;;  %v1423_v4 = vld [vmem:[#allocation2 + $0x30] sm:$0xff] }
  0x86   : > { %267 = vst.msk [vmem:[#allocation2 + $0x39] sm:$0xff] %vm261_vm2, %v248_v22 }
  0x8d   : > { %v307_v23 = vpop.permute.xlu2 %306  ;;  %v1435_v10 = vld [vmem:[#allocation2 + $0x38] sm:$0xff] }
  0x8e   : > { %950 = vpush %v307_v23 }
  0x95   : > { %v242_v24 = vpop.permute.xlu1 %241  ;;  %v313_v25 = vpop.permute.xlu2 %312 }
  0x96   : > { %264 = vst.msk [vmem:[#allocation2 + $0x19] sm:$0xff] %vm261_vm2, %v242_v24  ;;  %v238_v26 = vpop.permute.xlu0 %237 }
  0x97   : > { %262 = vst.msk [vmem:[#allocation2 + $0x1] sm:$0xff] %vm261_vm2, %v238_v26  ;;  %v1470_v26 = vld [vmem:[#allocation2 + $0x39] sm:$0xff] }
  0x9d   : > { %v244_v27 = vpop.permute.xlu1 %243  ;;  %v375_v28 = vpop.permute.xlu2 %374  ;;  %v1419_v1 = vld [vmem:[#allocation2 + $0x18] sm:$0xff] }
  0x9e   : > { %265 = vst.msk [vmem:[#allocation2 + $0x21] sm:$0xff] %vm261_vm2, %v244_v27  ;;  %v240_v29 = vpop.permute.xlu0 %239  ;;  %v1409_v49 = vld [vmem:[#allocation2] sm:$0xff] }
  0x9f   : > { %263 = vst.msk [vmem:[#allocation2 + $0x9] sm:$0xff] %vm261_vm2, %v240_v29 }
  0xa5   : > { %v252_v30 = vpop.permute.xlu1 %251  ;;  %v381_v31 = vpop.permute.xlu2 %380  ;;  %v1421_v2 = vld [vmem:[#allocation2 + $0x20] sm:$0xff] }
  0xa6   : > { %269 = vst.msk [vmem:[#allocation2 + $0x51] sm:$0xff] %vm261_vm2, %v252_v30  ;;  %v250_v33 = vpop.permute.xlu0 %249  ;;  %v1385_v34 = vld [vmem:[#allocation2 + $0x8] sm:$0xff] }
  0xa7   : > { %268 = vst.msk [vmem:[#allocation2 + $0x49] sm:$0xff] %vm261_vm2, %v250_v33  ;;  %v1391_v35 = vmul.f32 %v284_v32, %v1385_v34  ;;  %v1446_v15 = vld [vmem:[#allocation2 + $0x9] sm:$0xff] }
  0xad   : > { %v311_v37 = vpop.permute.xlu1 %310  ;;  %v483_v38 = vpop.permute.xlu2 %482  ;;  %v1481_v33 = vld [vmem:[#allocation2 + $0x51] sm:$0xff] }
  0xae   : > { %v1395_v39 = vld [vmem:[#allocation2 + $0x48] sm:$0xff]  ;;  %v1397_v40 = vld [vmem:[#allocation2 + $0x50] sm:$0xff]  ;;  %v309_v41 = vpop.permute.xlu0 %308 }
  0xaf   : > { %v1400_v42 = vmul.f32 %v296_v36, %v1395_v39  ;;  %v1403_v43 = vmul.f32 %v296_v36, %v1397_v40  ;;  %952 = vpush %v309_v41 }
  0xb0   : > { %954 = vpush %v311_v37 }
  0xb1   : > { %956 = vpush %v313_v25  ;;  %v1468_v25 = vld [vmem:[#allocation2 + $0x31] sm:$0xff] }
  0xb2   : > { %958 = vpush %v375_v28 }
  0xb5   : > { %v379_v44 = vpop.permute.xlu1 %378  ;;  %v489_v46 = vpop.permute.xlu2 %488 }
  0xb6   : > { %v377_v45 = vpop.permute.xlu0 %376 }
  0xb7   : > { %960 = vpush %v377_v45 }
  0xb8   : > { %962 = vpush %v379_v44 }
  0xb9   : > { %964 = vpush %v381_v31  ;;  %v1479_v31 = vld [vmem:[#allocation2 + $0x49] sm:$0xff] }
  0xba   : > { %966 = vpush %v1333_v14  ;;  %v1444_v14 = vld [vmem:[#allocation2 + $0x1] sm:$0xff] }
  0xbb   : > { %968 = vpush %v1326_v13 }
  0xbc   : > { %970 = vpush %v1324_v12 }
  0xbd   : > { %972 = vpush %v1343_v17  ;;  %v487_v47 = vpop.permute.xlu1 %486  ;;  %v555_v51 = vpop.permute.xlu2 %554 }
  0xbe   : > { %974 = vpush %v483_v38  ;;  %v485_v48 = vpop.permute.xlu0 %484 }
  0xbf   : > { %976 = vpush %v485_v48  ;;  %s951_s19 = spop %950 }
  0xc0   : > { %978 = vpush %v487_v47  ;;  %v315_v50 = vstv %s951_s19 }
  0xc1   : > { %980 = vpush %v489_v46  ;;  %v326_v52 = vmul.f32 %v315_v50, %v1409_v49  ;;  %v327_v53 = vmul.f32 %v315_v50, %v1385_v34 }
  0xc3   : > { %344 = vrot.lane.b32.xlu1 %v327_v53, %s1201_s4  ;;  %342 = vrot.lane.b32.xlu0 %v326_v52, %s1201_s4 }
  0xc5   : > { %v553_v54 = vpop.permute.xlu1 %552  ;;  %v661_v56 = vpop.permute.xlu2 %660 }
  0xc6   : > { %v551_v55 = vpop.permute.xlu0 %550 }
  0xc7   : > { %982 = vpush %v551_v55  ;;  %v1524_v55 = vld [vmem:[#allocation2 + $0xa] sm:$0xff] }
  0xc8   : > { %984 = vpush %v553_v54  ;;  %v1522_v54 = vld [vmem:[#allocation2 + $0x2] sm:$0xff] }
  0xc9   : > { %986 = vpush %v555_v51 }
  0xcd   : > { %v659_v57 = vpop.permute.xlu1 %658  ;;  %v727_v59 = vpop.permute.xlu2 %726 }
  0xce   : > { %v557_v58 = vpop.permute.xlu0 %556 }
  0xcf   : > { %988 = vpush %v557_v58 }
  0xd0   : > { %990 = vpush %v1341_v16 }
  0xd1   : > { %992 = vpush %v1361_v20  ;;  %v1458_v20 = vld [vmem:[#allocation2 + $0x21] sm:$0xff] }
  0xd2   : > { %994 = vpush %v1353_v19  ;;  %v1456_v19 = vld [vmem:[#allocation2 + $0x19] sm:$0xff] }
  0xd3   : > { %996 = vpush %v1351_v18 }
  0xd4   : > { %998 = vpush %v659_v57 }
  0xd5   : > { %1000 = vpush %v661_v56  ;;  %v665_v60 = vpop.permute.xlu1 %664  ;;  %v733_v63 = vpop.permute.xlu2 %732 }
  0xd6   : > { %v663_v61 = vpop.permute.xlu0 %662 }
  0xd7   : > { %1002 = vpush %v663_v61  ;;  %v1535_v61 = vld [vmem:[#allocation2 + $0x22] sm:$0xff] }
  0xd8   : > { %1004 = vpush %v665_v60  ;;  %v1533_v60 = vld [vmem:[#allocation2 + $0x1a] sm:$0xff] }
  0xd9   : > { %1006 = vpush %v727_v59 }
  0xdd   : > { %v731_v62 = vpop.permute.xlu1 %730 }
  0xde   : > { %v729_v0 = vpop.permute.xlu0 %728 }
  0xdf   : > { %1008 = vpush %v729_v0  ;;  %v1545_v0 = vld [vmem:[#allocation2 + $0x3a] sm:$0xff] }
  0xe0   : > { %1010 = vpush %v731_v62  ;;  %s953_s20 = spop %952 }
  0xe1   : > { %1012 = vpush %v733_v63  ;;  %v318_v3 = vstv %s953_s20  ;;  %s955_s25 = spop %954 }
  0xe2   : > { %v328_v5 = vmul.f32 %v318_v3, %v1419_v1  ;;  %v329_v6 = vmul.f32 %v318_v3, %v1421_v2  ;;  %v321_v7 = vstv %s955_s25  ;;  %s957_s26 = spop %956 }
  0xe3   : > { %v330_v8 = vmul.f32 %v321_v7, %v1423_v4  ;;  %v324_v9 = vstv %s957_s26  ;;  %s1431_s27 = spop %958  ;;  %v331_v11 = vmul.f32 %v321_v7, %v1435_v10  ;;  %v1555_v7 = vld [vmem:[#allocation2 + $0x4a] sm:$0xff] }
  0xe4   : > { %346 = vrot.lane.b32.xlu2 %v328_v5, %s1201_s4  ;;  %348 = vrot.lane.b32.xlu0 %v329_v6, %s1201_s4  ;;  %v332_v12 = vmul.f32 %v324_v9, %v1395_v39  ;;  %v333_v13 = vmul.f32 %v324_v9, %v1397_v40  ;;  %v383_v22 = vstv %s1431_s27 }
  0xe5   : > { %350 = vrot.lane.b32.xlu1 %v330_v8, %s1201_s4  ;;  %v394_v41 = vmul.f32 %v383_v22, %v1409_v49  ;;  %v395_v45 = vmul.f32 %v383_v22, %v1385_v34  ;;  %v1557_v8 = vld [vmem:[#allocation2 + $0x52] sm:$0xff] }
  0xe8   : > { %s1433_s28 = spop %960 }
  0xe9   : > { %s1437_s29 = spop %962  ;;  %v386_v28 = vstv %s1433_s28 }
  0xea   : > { %s1441_s30 = spop %964  ;;  %v396_v44 = vmul.f32 %v386_v28, %v1419_v1  ;;  %v389_v46 = vstv %s1437_s29  ;;  %v397_v47 = vmul.f32 %v386_v28, %v1421_v2 }
  0xeb   : > { %s967_s21 = spop %966  ;;  %v399_v48 = vmul.f32 %v389_v46, %v1435_v10  ;;  %v398_v34 = vmul.f32 %v389_v46, %v1423_v4  ;;  %v392_v50 = vstv %s1441_s30 }
  0xec   : > { %v455_v16 = vstv %s967_s21  ;;  %s969_s3 = spop %968  ;;  %352 = vrot.lane.b32.xlu2 %v331_v11, %s1201_s4  ;;  %354 = vrot.lane.b32.xlu0 %v332_v12, %s1201_s4  ;;  %v400_v52 = vmul.f32 %v392_v50, %v1395_v39  ;;  %v401_v57 = vmul.f32 %v392_v50, %v1397_v40  ;;  %v1543_v40 = vld [vmem:[#allocation2 + $0x32] sm:$0xff] }
  0xed   : > { %v1451_v17 = vmul.f32 %v455_v16, %v1444_v14  ;;  %v1454_v18 = vmul.f32 %v455_v16, %v1446_v15  ;;  %v458_v21 = vstv %s969_s3  ;;  %s971_s18 = spop %970  ;;  %356 = vrot.lane.b32.xlu1 %v333_v13, %s1201_s4 }
  0xee   : > { %v1463_v23 = vmul.f32 %v458_v21, %v1456_v19  ;;  %v1466_v24 = vmul.f32 %v458_v21, %v1458_v20  ;;  %v461_v27 = vstv %s971_s18  ;;  %s973_s19 = spop %972 }
  0xef   : > { %v1474_v29 = vmul.f32 %v461_v27, %v1468_v25  ;;  %v1477_v30 = vmul.f32 %v461_v27, %v1470_v26  ;;  %v464_v36 = vstv %s973_s19  ;;  %s1494_s20 = spop %974 }
  0xf0   : > { %v1484_v37 = vmul.f32 %v464_v36, %v1479_v31  ;;  %v1487_v38 = vmul.f32 %v464_v36, %v1481_v33  ;;  %s1497_s25 = spop %976  ;;  %v491_v13 = vstv %s1494_s20 }
  0xf1   : > { %s1500_s26 = spop %978  ;;  %v494_v51 = vstv %s1497_s25  ;;  %v502_v21 = vmul.f32 %v491_v13, %v1444_v14  ;;  %v503_v27 = vmul.f32 %v491_v13, %v1446_v15 }
  0xf2   : > { %s1504_s27 = spop %980  ;;  %v504_v53 = vmul.f32 %v494_v51, %v1456_v19  ;;  %v497_v16 = vstv %s1500_s26  ;;  %v505_v36 = vmul.f32 %v494_v51, %v1458_v20 }
  0xf3   : > { %v507_v22 = vmul.f32 %v497_v16, %v1470_v26 }
  0xf4   : > { %414 = vrot.lane.b32.xlu2 %v396_v44, %s1202_s5  ;;  %410 = vrot.lane.b32.xlu0 %v394_v41, %s1202_s5  ;;  %v506_v44 = vmul.f32 %v497_v16, %v1468_v25 }
  0xf5   : > { %412 = vrot.lane.b32.xlu1 %v395_v45, %s1202_s5  ;;  %v500_v45 = vstv %s1504_s27 }
  0xf8   : > { %s1507_s28 = spop %982 }
  0xf9   : > { %s1511_s21 = spop %984  ;;  %v559_v28 = vstv %s1507_s28 }
  0xfa   : > { %s1516_s29 = spop %986  ;;  %v570_v41 = vmul.f32 %v559_v28, %v1444_v14  ;;  %v562_v46 = vstv %s1511_s21  ;;  %v571_v50 = vmul.f32 %v559_v28, %v1446_v15 }
  0xfc   : > { %420 = vrot.lane.b32.xlu2 %v399_v48, %s1202_s5  ;;  %416 = vrot.lane.b32.xlu0 %v397_v47, %s1202_s5  ;;  %v508_v47 = vmul.f32 %v500_v45, %v1479_v31  ;;  %v573_v48 = vmul.f32 %v562_v46, %v1458_v20  ;;  %v565_v20 = vstv %s1516_s29 }
  0xfd   : > { %418 = vrot.lane.b32.xlu1 %v398_v34, %s1202_s5  ;;  %v509_v34 = vmul.f32 %v500_v45, %v1481_v33  ;;  %v575_v15 = vmul.f32 %v565_v20, %v1470_v26  ;;  %v298_v26 = vmul.f32 %v284_v32, %v1409_v49 }
 0x100   : > { %s1518_s3 = spop %988 }
 0x101   : > { %s991_s18 = spop %990  ;;  %v568_v14 = vstv %s1518_s3 }
 0x102   : > { %v631_v56 = vstv %s991_s18  ;;  %s993_s19 = spop %992  ;;  %v576_v51 = vmul.f32 %v568_v14, %v1479_v31  ;;  %v577_v31 = vmul.f32 %v568_v14, %v1481_v33 }
 0x103   : > { %v1528_v58 = vmul.f32 %v631_v56, %v1522_v54  ;;  %v1531_v59 = vmul.f32 %v631_v56, %v1524_v55  ;;  %v634_v39 = vstv %s993_s19  ;;  %s995_s30 = spop %994  ;;  %v574_v56 = vmul.f32 %v565_v20, %v1468_v25 }
 0x104   : > { %v1538_v62 = vmul.f32 %v634_v39, %v1533_v60  ;;  %v1541_v63 = vmul.f32 %v634_v39, %v1535_v61  ;;  %v637_v3 = vstv %s995_s30  ;;  %s997_s25 = spop %996  ;;  %522 = vrot.lane.b32.xlu2 %v504_v53, %s1201_s4  ;;  %422 = vrot.lane.b32.xlu0 %v400_v52, %s1202_s5  ;;  %v572_v52 = vmul.f32 %v562_v46, %v1456_v19 }
 0x105   : > { %v1550_v5 = vmul.f32 %v637_v3, %v1543_v40  ;;  %v1553_v6 = vmul.f32 %v637_v3, %v1545_v0  ;;  %v640_v9 = vstv %s997_s25  ;;  %424 = vrot.lane.b32.xlu1 %v401_v57, %s1202_s5  ;;  %s999_s20 = spop %998 }
 0x106   : > { %v1561_v11 = vmul.f32 %v640_v9, %v1555_v7  ;;  %v1564_v12 = vmul.f32 %v640_v9, %v1557_v8  ;;  %v667_v53 = vstv %s999_s20  ;;  %s1001_s26 = spop %1000 }
 0x107   : > { %v679_v57 = vmul.f32 %v667_v53, %v1524_v55  ;;  %v678_v39 = vmul.f32 %v667_v53, %v1522_v54  ;;  %v670_v16 = vstv %s1001_s26 }
 0x108   : > { %s1600_s27 = spop %1002  ;;  %v680_v32 = vmul.f32 %v670_v16, %v1533_v60 }
 0x109   : > { %v673_v19 = vstv %s1600_s27  ;;  %s1005_s28 = spop %1004  ;;  %s1134_s27 = scalar_lea.hbm %s1736_s2, 128 }
 0x10a   : > { %v682_v25 = vmul.f32 %v673_v19, %v1543_v40  ;;  %s1007_s6 = spop %1006  ;;  %v683_v45 = vmul.f32 %v673_v19, %v1545_v0 }
 0x10c   : > { %528 = vrot.lane.b32.xlu2 %v507_v22, %s1201_s4  ;;  %518 = vrot.lane.b32.xlu0 %v502_v21, %s1201_s4  ;;  %v676_v21 = vstv %s1005_s28  ;;  %v288_v22 = vstv %s1382_s7 }
 0x10d   : > { %520 = vrot.lane.b32.xlu1 %v503_v27, %s1201_s4  ;;  %v685_v49 = vmul.f32 %v676_v21, %v1557_v8  ;;  %v681_v27 = vmul.f32 %v670_v16, %v1535_v61 }
 0x110   : > { %s1009_s21 = spop %1008 }
 0x111   : > { %s1011_s7 = spop %1010 }
 0x112   : > { %v741_v14 = vstv %s1011_s7 }
 0x114   : > { %586 = vrot.lane.b32.xlu2 %v570_v41, %s1202_s5  ;;  %524 = vrot.lane.b32.xlu0 %v505_v36, %s1201_s4  ;;  %v738_v36 = vstv %s1009_s21 }
 0x115   : > { %526 = vrot.lane.b32.xlu1 %v506_v44, %s1201_s4  ;;  %v292_v44 = vstv %s1393_s8  ;;  %v748_v46 = vmul.f32 %v738_v36, %v1533_v60 }
 0x11c   : > { %592 = vrot.lane.b32.xlu2 %v573_v48, %s1202_s5  ;;  %530 = vrot.lane.b32.xlu0 %v508_v47, %s1201_s4  ;;  %v684_v47 = vmul.f32 %v676_v21, %v1555_v7  ;;  %v303_v48 = vmul.f32 %v292_v44, %v1435_v10 }
 0x11d   : > { %532 = vrot.lane.b32.xlu1 %v509_v34, %s1201_s4  ;;  %v735_v34 = vstv %s1007_s6 }
 0x11e   : > { %v747_v60 = vmul.f32 %v735_v34, %v1524_v55  ;;  %v302_v55 = vmul.f32 %v292_v44, %v1423_v4 }
 0x124   : > { %598 = vrot.lane.b32.xlu2 %v576_v51, %s1202_s5  ;;  %588 = vrot.lane.b32.xlu0 %v571_v50, %s1202_s5  ;;  %v746_v51 = vmul.f32 %v735_v34, %v1522_v54  ;;  %v301_v54 = vmul.f32 %v288_v22, %v1421_v2 }
 0x125   : > { %590 = vrot.lane.b32.xlu1 %v572_v52, %s1202_s5  ;;  %v751_v52 = vmul.f32 %v741_v14, %v1545_v0 }
 0x12c   : > { %696 = vrot.lane.b32.xlu2 %v679_v57, %s1201_s4  ;;  %594 = vrot.lane.b32.xlu0 %v574_v56, %s1202_s5  ;;  %v749_v56 = vmul.f32 %v738_v36, %v1535_v61  ;;  %v750_v57 = vmul.f32 %v741_v14, %v1543_v40 }
 0x12d   : > { %596 = vrot.lane.b32.xlu1 %v575_v15, %s1202_s5 }
 0x134   : > { %702 = vrot.lane.b32.xlu2 %v682_v25, %s1201_s4  ;;  %600 = vrot.lane.b32.xlu0 %v577_v31, %s1202_s5 }
 0x135   : > { %694 = vrot.lane.b32.xlu1 %v678_v39, %s1201_s4  ;;  %v345_v3 = vpop.permute.xlu1 %344  ;;  %v343_v9 = vpop.permute.xlu0 %342 }
 0x136   : > { %v1616_v13 = vadd.f32 %v345_v3, %v1391_v35  ;;  %v1618_v33 = vadd.f32 %v343_v9, %v298_v26  ;;  %v300_v35 = vmul.f32 %v288_v22, %v1419_v1 }
 0x13c   : > { %708 = vrot.lane.b32.xlu2 %v685_v49, %s1201_s4  ;;  %698 = vrot.lane.b32.xlu0 %v680_v32, %s1201_s4 }
 0x13d   : > { %700 = vrot.lane.b32.xlu1 %v681_v27, %s1201_s4 }
 0x13e   : > { %v347_v28 = vpop.permute.xlu2 %346 }
 0x13f   : > { %v368_v41 = vadd.f32 %v347_v28, %v300_v35 }
 0x144   : > { %766 = vrot.lane.b32.xlu2 %v748_v46, %s1202_s5  ;;  %704 = vrot.lane.b32.xlu0 %v683_v45, %s1201_s4 }
 0x145   : > { %706 = vrot.lane.b32.xlu1 %v684_v47, %s1201_s4  ;;  %s1013_s4 = spop %1012 }
 0x146   : > { %v353_v1 = vpop.permute.xlu2 %352  ;;  %v744_v19 = vstv %s1013_s4 }
 0x147   : > { %v371_v50 = vadd.f32 %v353_v1, %v303_v48  ;;  %v752_v40 = vmul.f32 %v744_v19, %v1555_v7  ;;  %v753_v26 = vmul.f32 %v744_v19, %v1557_v8 }
 0x14c   : > { %772 = vrot.lane.b32.xlu2 %v751_v52, %s1202_s5  ;;  %762 = vrot.lane.b32.xlu0 %v746_v51, %s1202_s5 }
 0x14d   : > { %764 = vrot.lane.b32.xlu1 %v747_v60, %s1202_s5 }
 0x14e   : > { %v415_v20 = vpop.permute.xlu2 %414 }
 0x14f   : > { %v436_v10 = vadd.f32 %v415_v20, %v368_v41 }
 0x151   : > { %v1643_v53 = vadd.f32 %v1463_v23, %v436_v10 }
 0x154   : > { %768 = vrot.lane.b32.xlu0 %v749_v56, %s1202_s5 }
 0x155   : > { %770 = vrot.lane.b32.xlu1 %v750_v57, %s1202_s5 }
 0x156   : > { %v421_v0 = vpop.permute.xlu2 %420  ;;  %v349_v15 = vpop.permute.xlu0 %348 }
 0x157   : > { %v439_v31 = vadd.f32 %v421_v0, %v371_v50  ;;  %v351_v25 = vpop.permute.xlu1 %350  ;;  %v369_v23 = vadd.f32 %v349_v15, %v301_v54 }
 0x158   : > { %v370_v39 = vadd.f32 %v351_v25, %v302_v55 }
 0x159   : > { %v479_v61 = vadd.f32 %v1477_v30, %v439_v31 }
 0x15c   : > { %774 = vrot.lane.b32.xlu0 %v752_v40, %s1202_s5 }
 0x15d   : > { %776 = vrot.lane.b32.xlu1 %v753_v26, %s1202_s5  ;;  %s1677_s5 = scalar_lea.vmem [#allocation6], %s933_s16  ;;  %s941_s16 = sshll.u32 %s1188_s12, 6 }
 0x15e   : > { %v523_v2 = vpop.permute.xlu2 %522  ;;  %v355_v3 = vpop.permute.xlu0 %354  ;;  %s818_s3 = scalar_lea.hbm %s1736_s2, %s941_s16  ;;  %s819_s18 = sshll.u32 %s1677_s5, 4  ;;  %s820_s18 = int_to_ptr.vmem [resolvable:$true] %s819_s18 }
 0x15f   : > { %v357_v4 = vpop.permute.xlu1 %356  ;;  %v372_v9 = vadd.f32 %v355_v3, %v1400_v42  ;;  %v544_v55 = vadd.f32 %v523_v2, %v1643_v53  ;;  %s821_s19 = sshll.u32 %s818_s3, 4  ;;  %s804_s12 = scalar_lea.sflag [#allocation5], %s1295_s15  ;;  %s822_s19 = int_to_ptr.hbm [resolvable:$true] %s821_s19 }
 0x160   : > { %v373_v16 = vadd.f32 %v357_v4, %v1403_v43  ;;  %s1128_s30 = sshra.s32 %s822_s19, 4  ;;  %s1129_s30 = int_to_ptr.hbm [resolvable:$true] %s1128_s30 }
 0x161   : > { %s1130_s25 = scalar_lea.hbm %s1129_s30, 64  ;;  %p1135_p7 = scmp.lt.s32.totalorder %s1129_s30, %s1736_s2 }
 0x162   : > { %p1131_p4 = scmp.ne.s32.totalorder %s1129_s30, %s1130_s25  ;;  %p1136_p8 = scmp.lt.s32.totalorder %s1134_s27, %s1130_s25 }
 0x164   : > { %p1132_p5 = pnand %p1131_p4, %p1272_p9  ;;  %p1137_p10 = por %p1136_p8, %p1135_p7 }
 0x166   : > { %v411_v21 = vpop.permute.xlu0 %410  ;;  %v529_v30 = vpop.permute.xlu2 %528  ;;  %p1133_p6 = pneg %p1132_p5 }
 0x167   : > { %v413_v22 = vpop.permute.xlu1 %412  ;;  %v434_v32 = vadd.f32 %v411_v21, %v1618_v33 }
 0x168   : > { %v435_v7 = vadd.f32 %v413_v22, %v1616_v13  ;;  %p1138_p13 = pnand %p1137_p10, %p1133_p6 }
 0x169   : > { %v474_v8 = vadd.f32 %v1451_v17, %v434_v32 }
 0x16a   : > { %v475_v49 = vadd.f32 %v1454_v18, %v435_v7 }
 0x16e   : > { %v417_v27 = vpop.permute.xlu0 %416  ;;  %v587_v42 = vpop.permute.xlu2 %586 }
 0x16f   : > { %v419_v35 = vpop.permute.xlu1 %418  ;;  %v437_v28 = vadd.f32 %v417_v27, %v369_v23 }
 0x170   : > { %v438_v36 = vadd.f32 %v419_v35, %v370_v39  ;;  %v547_v39 = vadd.f32 %v529_v30, %v479_v61 }
 0x171   : > { %v477_v41 = vadd.f32 %v1466_v24, %v437_v28 }
 0x172   : > { %v478_v43 = vadd.f32 %v1474_v29, %v438_v36 }
 0x176   : > { %v423_v44 = vpop.permute.xlu0 %422  ;;  %v593_v17 = vpop.permute.xlu2 %592 }
 0x177   : > { %v425_v45 = vpop.permute.xlu1 %424  ;;  %v440_v46 = vadd.f32 %v423_v44, %v372_v9 }
 0x178   : > { %v441_v33 = vadd.f32 %v425_v45, %v373_v16 }
 0x179   : > { %v480_v47 = vadd.f32 %v1484_v37, %v440_v46 }
 0x17a   : > { %v481_v13 = vadd.f32 %v1487_v38, %v441_v33 }
 0x17e   : > { %v519_v48 = vpop.permute.xlu0 %518  ;;  %v599_v50 = vpop.permute.xlu2 %598 }
 0x17f   : > { %v521_v18 = vpop.permute.xlu1 %520  ;;  %v542_v1 = vadd.f32 %v519_v48, %v474_v8 }
 0x180   : > { %v543_v54 = vadd.f32 %v521_v18, %v475_v49 }
 0x181   : > { %v610_v34 = vadd.f32 %v587_v42, %v542_v1 }
 0x183   : > { %v650_v14 = vadd.f32 %v1528_v58, %v610_v34 }
 0x186   : > { %v525_v24 = vpop.permute.xlu0 %524  ;;  %v697_v37 = vpop.permute.xlu2 %696 }
 0x187   : > { %v527_v51 = vpop.permute.xlu1 %526  ;;  %v545_v52 = vadd.f32 %v525_v24, %v477_v41 }
 0x189   : > { %v613_v29 = vadd.f32 %v593_v17, %v545_v52 }
 0x18b   : > { %v653_v60 = vadd.f32 %v1541_v63, %v613_v29  ;;  %v546_v63 = vadd.f32 %v527_v51, %v478_v43 }
 0x18e   : > { %v531_v20 = vpop.permute.xlu0 %530  ;;  %v703_v25 = vpop.permute.xlu2 %702 }
 0x18f   : > { %v533_v10 = vpop.permute.xlu1 %532  ;;  %v548_v56 = vadd.f32 %v531_v20, %v480_v47 }
 0x190   : > { %v549_v9 = vadd.f32 %v533_v10, %v481_v13 }
 0x191   : > { %v616_v57 = vadd.f32 %v599_v50, %v548_v56 }
 0x193   : > { %v656_v38 = vadd.f32 %v1561_v11, %v616_v57 }
 0x196   : > { %v589_v0 = vpop.permute.xlu0 %588  ;;  %v709_v2 = vpop.permute.xlu2 %708 }
 0x197   : > { %v591_v15 = vpop.permute.xlu1 %590  ;;  %v611_v58 = vadd.f32 %v589_v0, %v543_v54 }
 0x198   : > { %v612_v19 = vadd.f32 %v591_v15, %v544_v55 }
 0x199   : > { %v651_v31 = vadd.f32 %v1531_v59, %v611_v58 }
 0x19a   : > { %v652_v23 = vadd.f32 %v1538_v62, %v612_v19 }
 0x19b   : > { %v719_v35 = vadd.f32 %v697_v37, %v651_v31 }
 0x19e   : > { %v595_v40 = vpop.permute.xlu0 %594  ;;  %v767_v32 = vpop.permute.xlu2 %766 }
 0x19f   : > { %v597_v26 = vpop.permute.xlu1 %596  ;;  %v614_v3 = vadd.f32 %v595_v40, %v546_v63 }
 0x1a0   : > { %v615_v4 = vadd.f32 %v597_v26, %v547_v39 }
 0x1a1   : > { %v654_v11 = vadd.f32 %v1550_v5, %v614_v3 }
 0x1a2   : > { %v655_v53 = vadd.f32 %v1553_v6, %v615_v4 }
 0x1a3   : > { %v722_v44 = vadd.f32 %v703_v25, %v654_v11 }
 0x1a6   : > { %v601_v16 = vpop.permute.xlu0 %600 }
 0x1a7   : > { %v695_v21 = vpop.permute.xlu1 %694  ;;  %v617_v22 = vadd.f32 %v601_v16, %v549_v9 }
 0x1a8   : > { %v718_v27 = vadd.f32 %v695_v21, %v650_v14 }
 0x1a9   : > { %v657_v59 = vadd.f32 %v1564_v12, %v617_v22  ;;  %v773_v12 = vpop.permute.xlu2 %772 }
 0x1ab   : > { %v725_v17 = vadd.f32 %v709_v2, %v657_v59 }
 0x1ae   : > { %v699_v62 = vpop.permute.xlu0 %698 }
 0x1af   : > { %v701_v7 = vpop.permute.xlu1 %700  ;;  %v720_v61 = vadd.f32 %v699_v62, %v652_v23 }
 0x1b0   : > { %v721_v43 = vadd.f32 %v701_v7, %v653_v60 }
 0x1b1   : > { %v788_v30 = vadd.f32 %v767_v32, %v720_v61 }
 0x1b3   : > { %797 = vst.msk [vmem:[%s1677_s5 + $0x10] sm:$0xff] %vm794_vm3, %v788_v30 }
 0x1b6   : > { %v705_v5 = vpop.permute.xlu0 %704 }
 0x1b7   : > { %v707_v6 = vpop.permute.xlu1 %706  ;;  %v723_v8 = vadd.f32 %v705_v5, %v655_v53 }
 0x1b8   : > { %v724_v13 = vadd.f32 %v707_v6, %v656_v38 }
 0x1b9   : > { %v791_v49 = vadd.f32 %v773_v12, %v723_v8 }
 0x1bb   : > { %800 = vst.msk [vmem:[%s1677_s5 + $0x28] sm:$0xff] %vm794_vm3, %v791_v49 }
 0x1be   : > { %v763_v28 = vpop.permute.xlu0 %762 }
 0x1bf   : > { %v765_v36 = vpop.permute.xlu1 %764  ;;  %v786_v41 = vadd.f32 %v763_v28, %v718_v27 }
 0x1c0   : > { %v787_v42 = vadd.f32 %v765_v36, %v719_v35 }
 0x1c1   : > { %795 = vst.msk [vmem:[%s1677_s5] sm:$0xff] %vm794_vm3, %v786_v41 }
 0x1c2   : > { %796 = vst.msk [vmem:[%s1677_s5 + $0x8] sm:$0xff] %vm794_vm3, %v787_v42 }
 0x1c6   : > { %v769_v45 = vpop.permute.xlu0 %768 }
 0x1c7   : > { %v771_v46 = vpop.permute.xlu1 %770  ;;  %v789_v33 = vadd.f32 %v769_v45, %v721_v43 }
 0x1c8   : > { %v790_v47 = vadd.f32 %v771_v46, %v722_v44 }
 0x1c9   : > { %798 = vst.msk [vmem:[%s1677_s5 + $0x18] sm:$0xff] %vm794_vm3, %v789_v33 }
 0x1ca   : > { %799 = vst.msk [vmem:[%s1677_s5 + $0x20] sm:$0xff] %vm794_vm3, %v790_v47 }
 0x1ce   : > { %v775_v48 = vpop.permute.xlu0 %774 }
 0x1cf   : > { %v777_v18 = vpop.permute.xlu1 %776  ;;  %v792_v1 = vadd.f32 %v775_v48, %v724_v13 }
 0x1d0   : > { %v793_v34 = vadd.f32 %v777_v18, %v725_v17 }
 0x1d1   : > { %801 = vst.msk [vmem:[%s1677_s5 + $0x30] sm:$0xff] %vm794_vm3, %v792_v1 }
 0x1d2   : > { %802 = vst.msk [vmem:[%s1677_s5 + $0x38] sm:$0xff] %vm794_vm3, %v793_v34 }
 0x1d3   : > { %1141 = shalt.err (!%p1138_p13)
}
 0x1d4   : > { %s1204_s15 = smov 128   ;;  %s1205_s21 = smov 8  }
 0x1d5   : > { %1016 = dma.vmem_to_hbm [thread:$0]  (%p1272_p9), %s820_s18, 1024, %s822_s19, %s804_s12, %s1204_s15, %s1204_s15, %s1205_s21  }
 0x1d6 PF: > { %s836_s7 = sand.u32 1, %s1176_s9   ;;  %p1023_p0 = pnand %p928_p12, %p1279_p11 }
 0x1d7   : > { %s837_s4 = scalar_lea.sflag [#allocation5], %s836_s7 }
 0x1d8   : > { %p1024_p1 = pneg %p1023_p0 }
 0x1da   : > { %1171 = dma.done.wait (%p1024_p1), %s837_s4, 1024  }
 0x1db   : > { %1173 = vsyncadd (%p1024_p1), %s837_s4, 4294966272  ;;  %s18_s14 = sadd.s32 1, %s1196_s14   ;;  %s1741_s9 = smov %s1180_s10 }
 0x1dc   : > { %p15_p2 = scmp.ge.s32.totalorder %s18_s14, 4   ;;  %s1742_s10 = smov %s1184_s11 }
 0x1dd   : > { %s1743_s11 = smov %s1277_s23  ;;  %s1744_s12 = smov %s1192_s13 }
 0x1de   : > { %s1745_s13 = smov %s1747_s17  ;;  %17 = sbr.rel (!%p15_p2) target bundleno = 6 (0x6), region = 76 }
 0x1e3   :  { %843 = vsyncpa [#allocation4], 1 }
 0x1e4   :  { %845 = vsyncpa [#allocation4 + $0x1], 1 }
 0x1e5   :  { %846 = vsyncpa [#allocation5], 1 }
 0x1e6   :  { %848 = vsyncpa [#allocation5 + $0x1], 1 }

</bundles_post_ra>
